<compile_context>
chip_gen: v7x
topology: tpu7x:2x2x1
jax: 0.10.0
libtpu: 0.0.40
codegen_flags: <defaults>
</compile_context>

<pallas_src>
import functools

import jax
import jax.numpy as jnp
from jax.experimental import pallas as pl
from jax.experimental.pallas import tpu as pltpu


def _conv1d_taps_kernel(x_ref, w_ref, b_ref, o_ref, *, K, dilation):
    # x_ref: (1, C_in, L_pad)   -- full padded sequence of this batch element
    # w_ref: (K, C_out, C_in)   -- weight, tap-major (w_ref[k] is an MXU operand)
    # b_ref: (C_out, 1)         -- bias (zeros when the module has bias=False)
    # o_ref: (1, C_out, L_out)  -- dense output slab for this batch element
    C_out = o_ref.shape[1]
    L_out = o_ref.shape[2]
    acc = jnp.zeros((C_out, L_out), jnp.float32)
    for k in range(K):                      # static unroll; K is small
        start = k * dilation                # static slice start (stride == 1)
        xs = x_ref[0, :, start:start + L_out]          # (C_in, L_out)
        acc = acc + jnp.dot(
            w_ref[k], xs,
            preferred_element_type=jnp.float32,
            precision=jax.lax.Precision.HIGHEST,
        )
    acc = acc + b_ref[...]                  # (C_out, 1) broadcasts over lanes
    o_ref[0, :, :] = acc.astype(o_ref.dtype)


def conv_norm_1d(x, weight, bias=None, *, stride=1, padding=None,
                 padding_mode="reflect", dilation=1, groups=1):
    """ConvNorm1d.forward: conv1d(x, weight, bias) with PyTorch semantics.

    x:      (B, C_in, L)
    weight: (C_out, C_in // groups, K)   (PyTorch Conv1d layout)
    bias:   (C_out,) or None
    """
    B, C_in, L = x.shape
    C_out, C_in_g, K = weight.shape

    # TODO(synk): grouped (groups>1) / strided (stride>1) conv not implemented.
    assert groups == 1 and C_in_g == C_in, "groups > 1 not supported"
    assert stride == 1, "stride > 1 not supported"

    if padding is None:
        assert dilation * (K - 1) % 2 == 0
        padding = (dilation * (K - 1)) // 2

    if padding > 0:
        mode = {"reflect": "reflect", "replicate": "edge",
                "zeros": "constant", "circular": "wrap"}[padding_mode]
        x_pad = jnp.pad(x, ((0, 0), (0, 0), (padding, padding)), mode=mode)
    else:
        x_pad = x
    L_pad = L + 2 * padding
    L_out = L_pad - dilation * (K - 1)      # stride == 1

    # Tap-major weight so w_ref[k] is a clean (C_out, C_in) matrix.
    w_t = jnp.transpose(weight, (2, 0, 1))  # (K, C_out, C_in)
    if bias is None:
        b2 = jnp.zeros((C_out, 1), dtype=x.dtype)
    else:
        b2 = bias.reshape(C_out, 1).astype(x.dtype)

    # Explicit scoped-VMEM budget: ~2 pipeline buffers per operand + headroom,
    # clamped to [16, 32] MiB so it is valid on v5e / v6e / v7x.
    itemsize = jnp.dtype(x.dtype).itemsize
    block_bytes = (C_in * L_pad + K * C_out * C_in + C_out + C_out * L_out) * itemsize
    vmem_limit = int(min(max(4 * block_bytes + (4 << 20), 16 << 20), 32 << 20))

    kernel = functools.partial(_conv1d_taps_kernel, K=K, dilation=dilation)

    return pl.pallas_call(
        kernel,
        out_shape=jax.ShapeDtypeStruct((B, C_out, L_out), x.dtype),
        grid_spec=pl.GridSpec(
            grid=(B,),
            in_specs=[
                pl.BlockSpec((1, C_in, L_pad), lambda b: (b, 0, 0)),
                pl.BlockSpec((K, C_out, C_in), lambda b: (0, 0, 0)),
                pl.BlockSpec((C_out, 1), lambda b: (0, 0)),
            ],
            out_specs=pl.BlockSpec((1, C_out, L_out), lambda b: (b, 0, 0)),
        ),
        compiler_params=pltpu.CompilerParams(
            dimension_semantics=("parallel",),
            vmem_limit_bytes=vmem_limit,
        ),
    )(x_pad, w_t, b2)


if __name__ == "__main__":
    key = jax.random.PRNGKey(0)
    kx, kw, kb = jax.random.split(key, 3)

    # Small shapes consistent with ConvNorm1d usage: signal is (B, C_in, L).
    B, C_in, C_out, L, K = 2, 4, 8, 16, 3
    stride, dilation, groups = 1, 1, 1

    x = jax.random.normal(kx, (B, C_in, L), dtype=jnp.float32)

    # Xavier-uniform init with gain('linear') == 1.0, like the PyTorch module.
    fan_in, fan_out = C_in * K, C_out * K
    w_bound = (6.0 / (fan_in + fan_out)) ** 0.5
    weight = jax.random.uniform(kw, (C_out, C_in, K), jnp.float32, -w_bound, w_bound)
    b_bound = 1.0 / (fan_in ** 0.5)
    bias = jax.random.uniform(kb, (C_out,), jnp.float32, -b_bound, b_bound)

    y = conv_norm_1d(x, weight, bias, stride=stride, dilation=dilation,
                     groups=groups, padding_mode="reflect")
    y = jax.block_until_ready(y)

    # Reference: XLA conv on the same reflect-padded input.
    pad = (dilation * (K - 1)) // 2
    x_pad = jnp.pad(x, ((0, 0), (0, 0), (pad, pad)), mode="reflect")
    y_ref = jax.lax.conv_general_dilated(
        x_pad, weight,
        window_strides=(stride,),
        padding="VALID",
        rhs_dilation=(dilation,),
        dimension_numbers=("NCH", "OIH", "NCH"),
        feature_group_count=groups,
        precision=jax.lax.Precision.HIGHEST,
    ) + bias[None, :, None]

    assert y.shape == (B, C_out, L), y.shape
    assert y.dtype == x.dtype
    assert jnp.allclose(y, y_ref, atol=1e-4, rtol=1e-4)

    print("KERNEL_OK")
</pallas_src>

<mosaic_0001>
module attributes {stable_mosaic.version = 11 : i64} {
  func.func @_conv1d_taps_kernel(%arg0: i32, %arg1: memref<1x4x18xf32, #tpu.memory_space<vmem>>, %arg2: memref<3x8x4xf32, #tpu.memory_space<vmem>>, %arg3: memref<8x1xf32, #tpu.memory_space<vmem>>, %arg4: memref<1x8x16xf32, #tpu.memory_space<vmem>>) attributes {dimension_semantics = [#tpu.dimension_semantics<parallel>], iteration_bounds = array<i64: 2>, scalar_prefetch = 0 : i64, scratch_operands = 0 : i64, tpu.core_type = #tpu.core_type<tc>, window_params = [{transform_indices = @transform_0, window_bounds = array<i64: 1, 4, 18>}, {pipeline_mode = #tpu.pipeline_mode<synchronous>, transform_indices = @transform_1, window_bounds = array<i64: 3, 8, 4>}, {pipeline_mode = #tpu.pipeline_mode<synchronous>, transform_indices = @transform_2, window_bounds = array<i64: 8, 1>}, {transform_indices = @transform_3, window_bounds = array<i64: 1, 8, 16>}]} {
    %cst = arith.constant 0.000000e+00 : f32
    %0 = vector.broadcast %cst : f32 to vector<8x16xf32>
    %c0 = arith.constant 0 : index
    %c0_0 = arith.constant 0 : index
    %c0_1 = arith.constant 0 : index
    %1 = vector.load %arg1[%c0, %c0_0, %c0_1] : memref<1x4x18xf32, #tpu.memory_space<vmem>>, vector<1x4x16xf32>
    %2 = vector.shape_cast %1 : vector<1x4x16xf32> to vector<4x16xf32>
    %c0_2 = arith.constant 0 : index
    %c0_3 = arith.constant 0 : index
    %c0_4 = arith.constant 0 : index
    %3 = vector.load %arg2[%c0_2, %c0_3, %c0_4] : memref<3x8x4xf32, #tpu.memory_space<vmem>>, vector<1x8x4xf32>
    %4 = vector.shape_cast %3 : vector<1x8x4xf32> to vector<8x4xf32>
    %cst_5 = arith.constant dense<0.000000e+00> : vector<8x16xf32>
    %5 = tpu.matmul %4, %2, %cst_5 {dimension_numbers = #tpu.dot_dimension_numbers<[1], [0], [0], [1], [0, 0, 1, 1], [], []>, precision = #tpu.contract_precision<fp32>} : vector<8x4xf32>, vector<4x16xf32>, vector<8x16xf32> -> vector<8x16xf32>
    %6 = arith.addf %0, %5 : vector<8x16xf32>
    %c0_6 = arith.constant 0 : index
    %c0_7 = arith.constant 0 : index
    %c1 = arith.constant 1 : index
    %7 = vector.load %arg1[%c0_6, %c0_7, %c1] : memref<1x4x18xf32, #tpu.memory_space<vmem>>, vector<1x4x16xf32>
    %8 = vector.shape_cast %7 : vector<1x4x16xf32> to vector<4x16xf32>
    %c1_8 = arith.constant 1 : index
    %c0_9 = arith.constant 0 : index
    %c0_10 = arith.constant 0 : index
    %9 = vector.load %arg2[%c1_8, %c0_9, %c0_10] : memref<3x8x4xf32, #tpu.memory_space<vmem>>, vector<1x8x4xf32>
    %10 = vector.shape_cast %9 : vector<1x8x4xf32> to vector<8x4xf32>
    %cst_11 = arith.constant dense<0.000000e+00> : vector<8x16xf32>
    %11 = tpu.matmul %10, %8, %cst_11 {dimension_numbers = #tpu.dot_dimension_numbers<[1], [0], [0], [1], [0, 0, 1, 1], [], []>, precision = #tpu.contract_precision<fp32>} : vector<8x4xf32>, vector<4x16xf32>, vector<8x16xf32> -> vector<8x16xf32>
    %12 = arith.addf %6, %11 : vector<8x16xf32>
    %c0_12 = arith.constant 0 : index
    %c0_13 = arith.constant 0 : index
    %c2 = arith.constant 2 : index
    %13 = vector.load %arg1[%c0_12, %c0_13, %c2] : memref<1x4x18xf32, #tpu.memory_space<vmem>>, vector<1x4x16xf32>
    %14 = vector.shape_cast %13 : vector<1x4x16xf32> to vector<4x16xf32>
    %c2_14 = arith.constant 2 : index
    %c0_15 = arith.constant 0 : index
    %c0_16 = arith.constant 0 : index
    %15 = vector.load %arg2[%c2_14, %c0_15, %c0_16] : memref<3x8x4xf32, #tpu.memory_space<vmem>>, vector<1x8x4xf32>
    %16 = vector.shape_cast %15 : vector<1x8x4xf32> to vector<8x4xf32>
    %cst_17 = arith.constant dense<0.000000e+00> : vector<8x16xf32>
    %17 = tpu.matmul %16, %14, %cst_17 {dimension_numbers = #tpu.dot_dimension_numbers<[1], [0], [0], [1], [0, 0, 1, 1], [], []>, precision = #tpu.contract_precision<fp32>} : vector<8x4xf32>, vector<4x16xf32>, vector<8x16xf32> -> vector<8x16xf32>
    %18 = arith.addf %12, %17 : vector<8x16xf32>
    %c0_18 = arith.constant 0 : index
    %c0_19 = arith.constant 0 : index
    %19 = vector.load %arg3[%c0_18, %c0_19] : memref<8x1xf32, #tpu.memory_space<vmem>>, vector<8x1xf32>
    %20 = vector.broadcast %19 : vector<8x1xf32> to vector<8x16xf32>
    %21 = arith.addf %18, %20 : vector<8x16xf32>
    %c0_20 = arith.constant 0 : index
    %c0_21 = arith.constant 0 : index
    %c0_22 = arith.constant 0 : index
    %22 = vector.load %arg4[%c0_20, %c0_21, %c0_22] : memref<1x8x16xf32, #tpu.memory_space<vmem>>, vector<1x8x16xf32>
    %23 = vector.shape_cast %22 : vector<1x8x16xf32> to vector<8x16xf32>
    %24 = vector.shape_cast %21 : vector<8x16xf32> to vector<1x8x16xf32>
    tpu.vector_store %arg4[%c0_20, %c0_21, %c0_22], %24 {strides = array<i32>} : memref<1x8x16xf32, #tpu.memory_space<vmem>>, vector<1x8x16xf32>,
    return
  }
  func.func @transform_0(%arg0: i32) -> (i32, i32, i32) {
    %c0_i32 = arith.constant 0 : i32
    %c0_i32_0 = arith.constant 0 : i32
    %c0_i32_1 = arith.constant 0 : i32
    return %arg0, %c0_i32, %c0_i32_0 : i32, i32, i32
  }
  func.func @transform_1(%arg0: i32) -> (i32, i32, i32) {
    %c0_i32 = arith.constant 0 : i32
    %c0_i32_0 = arith.constant 0 : i32
    %c0_i32_1 = arith.constant 0 : i32
    %c0_i32_2 = arith.constant 0 : i32
    return %c0_i32, %c0_i32_0, %c0_i32_1 : i32, i32, i32
  }
  func.func @transform_2(%arg0: i32) -> (i32, i32) {
    %c0_i32 = arith.constant 0 : i32
    %c0_i32_0 = arith.constant 0 : i32
    %c0_i32_1 = arith.constant 0 : i32
    return %c0_i32, %c0_i32_0 : i32, i32
  }
  func.func @transform_3(%arg0: i32) -> (i32, i32, i32) {
    %c0_i32 = arith.constant 0 : i32
    %c0_i32_0 = arith.constant 0 : i32
    %c0_i32_1 = arith.constant 0 : i32
    return %arg0, %c0_i32, %c0_i32_0 : i32, i32, i32
  }
}

</mosaic_0001>

<bundles_post_ra>
// kernel: tpu_custom_call.1
= control target key start
LH: loop header
LB: loop body
LE: loop exit
PB: predicated region body
PF: predicated region fallthrough
CT: control target
= control target key end

     0   :  { %8 = vsyncpa [#allocation3], 0  ;;  %s2084_s0 = inlined_call_operand.vmem [shape: f32[2,4,18], index: 0, kind: input, shape index: {}]   ;;  %s2085_s1 = inlined_call_operand.vmem [shape: f32[3,8,4], index: 1, kind: input, shape index: {}]   ;;  %s2086_s2 = inlined_call_operand.vmem [shape: f32[8,1], index: 2, kind: input, shape index: {}]   ;;  %s2087_s3 = inlined_call_operand.hbm [shape: f32[2,8,16], index: 3, kind: output, shape index: {}]  }
   0x1   :  { %10 = vsyncpa [#allocation3 + $0x1], 0  ;;  %s1889_s12 = smov 0   ;;  %s1891_s13 = smov 0  }
   0x2   :  { %s1893_s14 = smov 0   ;;  %s1895_s15 = smov 0  }
   0x3 LB: > { %s1910_s16 = sadd.s32 4294967295, %s1861_s15   ;;  %s1615_s17 = sadd.s32 4294967294, %s1861_s15   ;;  %s1861_s15 = sphi %s1895_s15, %s2093_s15   ;;  %s1857_s14 = sphi %s1893_s14, %s2092_s14   ;;  %s1853_s13 = sphi %s1891_s13, %s2091_s13   ;;  %s1849_s12 = sphi %s1889_s12, %s2090_s12  }
   0x4   : > { %s1914_s18 = sadd.s32 1, %s1861_s15   ;;  %s91_s19 = sadd.s32 1, %s1857_s14 }
   0x5   : > { %s88_s20 = ssub.s32 %s1861_s15, %s1914_s18  ;;  %p101_p0 = scmp.ne.s32.totalorder %s1857_s14, %s1853_s13 }
   0x6   : > { %p89_p1 = scmp.eq.s32.totalorder %s88_s20, 0  ;;  %p102_p2 = scmp.eq.s32.totalorder %s1910_s16, 1 }
   0x7   : > { %p107_p3 = scmp.ne.s32.totalorder %s1853_s13, %s1849_s12  ;;  %p108_p4 = scmp.eq.s32.totalorder %s1615_s17, 1 }
   0x8   : > { %s1925_s21 = scalar_select %p89_p1, %s1857_s14, %s91_s19  }
   0x9   : > { %p1927_p5 = por %p102_p2, %p101_p0  ;;  %p1931_p6 = por %p108_p4, %p107_p3 }
   0xa   : > { %p1618_p7 = scmp.ge.s32.totalorder %s1861_s15, 1  ;;  %p139_p8 = scmp.lt.s32.totalorder %s1861_s15, 3 }
   0xc   : > { %p140_p9 = pnand %p1618_p7, %p139_p8 }
   0xd   : > { %p162_p10 = scmp.lt.s32.totalorder (!%p140_p9), %s1910_s16, 1  ;;  %v1863_v0 = vmov (!%p140_p9), 0.0   ;;  %vm1864_vm0 = vmmov (!%p140_p9), 0   ;;  %s1865_s29 = smov (!%p140_p9), 127   ;;  %v1533_v2 = vld [vmem:[%s2086_s2] sm:$0xff] (!%p140_p9)  ;;  %v1867_v3 = vmov (!%p140_p9), 0  }
   0xe   : > { %143 = sbr.rel (%p140_p9) target bundleno = 417 (0x1a1), region = 32  ;;  %1663 = vmatprep.subr.mxu0 (!%p140_p9), %v1863_v0  ;;  %1665 = vmatprep.mubr.msk.f32.mxu0 (!%p140_p9), %vm1864_vm0, %v1863_v0  ;;  %s1866_s30 = smov (!%p140_p9), 126   ;;  %v1621_v4 = vld [vmem:[%s2085_s1 + $0x8] sm:$0xff] (!%p140_p9)  ;;  %vm173_vm1 = vcmask (!%p140_p9), 31744   ;;  %v167_v8 = vld [vmem:[%s2085_s1] sm:$0xff] (!%p140_p9)  ;;  %vm177_vm2 = vcmask (!%p140_p9), 1043456  }
   0xf   : > { %1668 = vmatprep.subr.mxu1 (!%p140_p9), %v1863_v0  ;;  %1670 = vmatprep.mubr.msk.f32.mxu1 (!%p140_p9), %vm1864_vm0, %v1863_v0  ;;  %v175_v5 = vsel (!%p140_p9), %vm173_vm1, %v1621_v4, 0  ;;  %v627_v10 = vsel (!%p140_p9), %vm173_vm1, %v167_v8, 0  ;;  %v1622_v21 = vld [vmem:[%s2085_s1 + $0x10] sm:$0xff] (!%p140_p9)  ;;  %s159_s17 = sand.u32 (!%p140_p9), 1, %s1853_s13   ;;  %s1624_s20 = sshll.u32 (!%p140_p9), %s1910_s16, 7  ;;  %vm1540_vm3 = vcmask (!%p140_p9), 130048  }
  0x10   : > { %1797 = vset.pattern.permute.xlu1 (!%p140_p9), %v1867_v3  ;;  %1798 = vset.pattern.permute.xlu0 (!%p140_p9), %v1867_v3  ;;  %v246_v6 = vand.u32 (!%p140_p9), 4294901760, %v175_v5  ;;  %v1959_v12 = vand.u32 (!%p140_p9), 4294901760, %v627_v10  ;;  %v1082_v25 = vsel (!%p140_p9), %vm173_vm1, %v1622_v21, 0  ;;  %s1619_s19 = sshll.u32 (!%p140_p9), %s159_s17, 3 }
  0x11   : > { %1536 = vperm.xlu1 (!%p140_p9), %1797, %v1533_v2   ;;  %v1981_v31 = vand.u32 (!%p140_p9), 4294901760, %v1082_v25 }
  0x12   : > { %v247_v7 = vsub.f32 (!%p140_p9), %v175_v5, %v246_v6  ;;  %v1966_v19 = vsub.f32 (!%p140_p9), %v627_v10, %v1959_v12 }
  0x13   : > { %v1153_v36 = vsub.f32 (!%p140_p9), %v1082_v25, %v1981_v31 }
  0x14   : > { %v248_v9 = vand.u32 (!%p140_p9), 4294901760, %v247_v7  ;;  %v699_v24 = vand.u32 (!%p140_p9), 4294901760, %v1966_v19 }
  0x15   : > { %s163_s24 = scalar_select %p162_p10, %s1910_s16, 1  ;;  %v1154_v39 = vand.u32 4294901760, %v1153_v36 }
  0x16   : > { %v249_v11 = vsub.f32 %v247_v7, %v248_v9  ;;  %v700_v29 = vsub.f32 %v1966_v19, %v699_v24  ;;  %s1868_s16 = smov [#allocation2]  }
  0x17   : > { %s1620_s25 = sshll.u32 %s163_s24, 2  ;;  %v1155_v41 = vsub.f32 %v1153_v36, %v1154_v39  ;;  %s161_s24 = scalar_lea.vmem [#allocation2], %s1619_s19 }
  0x18   : > { %s165_s28 = scalar_lea.vmem %s2084_s0, %s1620_s25  ;;  %v250_v16 = vand.u32 4294901760, %v249_v11  ;;  %v701_v33 = vand.u32 4294901760, %v700_v29  ;;  %s1556_s25 = sshll.u32 %s161_s24, 4  ;;  %s2044_s25 = int_to_ptr.vmem [resolvable:$true] %s1556_s25 }
  0x19   : > { %v166_v1 = vld [vmem:[%s165_s28] sm:$0xf]  ;;  %v1156_v43 = vand.u32 4294901760, %v1155_v41  ;;  %s2042_s28 = scalar_lea.hbm %s2087_s3, %s1624_s20  ;;  %s1803_s4 = sshll.u32 %s1868_s16, 4  ;;  %s1804_s4 = int_to_ptr.vmem [resolvable:$false] %s1803_s4 }
  0x1a   : > { %171 = vrot.lane.b32.xlu0 %v166_v1, %s1865_s29  ;;  %v629_v13 = vsel %vm177_vm2, %v166_v1, 0  ;;  %s1543_s29 = scalar_lea.sflag [#allocation3], %s159_s17  ;;  %s1805_s5 = scalar_lea.vmem %s1804_s4, 256 }
  0x1b   : > { %v1963_v18 = vand.u32 4294901760, %v629_v13  ;;  %p1806_p0 = scmp.lt.s32.totalorder %s2044_s25, %s1804_s4 }
  0x1d   : > { %v709_v23 = vsub.f32 %v629_v13, %v1963_v18 }
  0x1e   : > { %1079 = vrot.lane.b32.xlu0 %v166_v1, %s1866_s30  ;;  %s1799_s30 = scalar_lea.vmem %s2044_s25, 128 }
  0x1f   : > { %v710_v30 = vand.u32 4294901760, %v709_v23  ;;  %p1800_p11 = scmp.ne.s32.totalorder %s2044_s25, %s1799_s30  ;;  %p1807_p1 = scmp.lt.s32.totalorder %s1805_s5, %s1799_s30 }
  0x21   : > { %v711_v35 = vsub.f32 %v709_v23, %v710_v30  ;;  %p1801_p12 = pnand %p1800_p11, %p1927_p5  ;;  %p1808_p2 = por %p1807_p1, %p1806_p0 }
  0x23   : > { %v712_v38 = vand.u32 4294901760, %v711_v35  ;;  %p1802_p13 = pneg %p1801_p12 }
  0x25   : > { %p1809_p3 = pnand %p1808_p2, %p1802_p13 }
  0x8c   : > { %v172_v14 = vpop.permute.xlu0 %171 }
  0x8d   : > { %v178_v15 = vsel %vm177_vm2, %v172_v14, 0 }
  0x8e   : > { %v181_v17 = vand.u32 4294901760, %v178_v15 }
  0x90   : > { %v258_v20 = vsub.f32 %v178_v15, %v181_v17  ;;  %1664 = vmatpush3.msra.mxu0 %v181_v17  ;;  %v1080_v27 = vpop.permute.xlu0 %1079 }
  0x91   : > { %1666 = vmatmul.mubr.f32.vlgmr.msra.gmra.mrb[0].mxu0 %v250_v16  ;;  %1673 = vmatprep.subr.mxu0 %v1863_v0  ;;  %v1084_v32 = vsel %vm177_vm2, %v1080_v27, 0 }
  0x92   : > { %v259_v22 = vand.u32 4294901760, %v258_v20  ;;  %1674 = vmatpush3.msra.mxu0 %v258_v20  ;;  %1675 = vmatprep.mubr.msk.f32.mxu0 %vm1864_vm0, %v1863_v0  ;;  %v1087_v34 = vand.u32 4294901760, %v1084_v32 }
  0x93   : > { %1683 = vmatprep.subr.mxu0 %v1863_v0 }
  0x94   : > { %v260_v26 = vsub.f32 %v258_v20, %v259_v22  ;;  %v1164_v37 = vsub.f32 %v1084_v32, %v1087_v34 }
  0x95   : > { %1676 = vmatmul.mubr.f32.vlgmr.msra.gmra.mrb[2].mxu0 %v247_v7 }
  0x96   : > { %1684 = vmatpush3.msra.mxu0 %v259_v22  ;;  %v261_v28 = vand.u32 4294901760, %v260_v26  ;;  %1685 = vmatprep.mubr.msk.f32.mxu0 %vm1864_vm0, %v1863_v0  ;;  %v1165_v40 = vand.u32 4294901760, %v1164_v37 }
  0x97   : > { %1693 = vmatprep.subr.mxu0 %v1863_v0 }
  0x98   : > { %1669 = vmatpush3.msra.mxu1 %v261_v28  ;;  %v1166_v42 = vsub.f32 %v1164_v37, %v1165_v40 }
  0x99   : > { %1671 = vmatmul.mubr.f32.vlgmr.msra.gmra.mrb[0].mxu1 %v246_v6  ;;  %1678 = vmatprep.subr.mxu1 %v1863_v0 }
  0x9a   : > { %1686 = vmatmul.mubr.f32.vlgmr.msra.gmra.mrb[4].mxu0 %v246_v6  ;;  %1679 = vmatpush3.msra.mxu1 %v181_v17  ;;  %v1167_v44 = vand.u32 4294901760, %v1166_v42 }
  0x9b   : > { %1680 = vmatprep.mubr.msk.f32.mxu1 %vm1864_vm0, %v1863_v0  ;;  %1688 = vmatprep.subr.mxu1 %v1863_v0 }
  0x9c   : > { %1694 = vmatpush3.msra.mxu0 %v1963_v18  ;;  %1695 = vmatprep.mubr.msk.f32.mxu0 %vm1864_vm0, %v1863_v0 }
  0x9d   : > { %1681 = vmatmul.mubr.f32.vlgmr.msra.gmra.mrb[2].mxu1 %v248_v9  ;;  %1703 = vmatprep.subr.mxu0 %v1863_v0 }
  0x9e   : > { %1689 = vmatpush3.msra.mxu1 %v181_v17  ;;  %1696 = vmatmul.mubr.f32.vlgmr.msra.gmra.mrb[6].mxu0 %v701_v33  ;;  %v1537_v33 = vpop.permute.xlu1 %1536 }
  0x9f   : > { %1690 = vmatprep.mubr.msk.f32.mxu1 %vm1864_vm0, %v1863_v0  ;;  %1704 = vmatpush3.msra.mxu0 %v709_v23 }
  0xa0   : > { %1705 = vmatprep.mubr.msk.f32.mxu0 %vm1864_vm0, %v1863_v0  ;;  %1698 = vmatprep.subr.mxu1 %v1863_v0 }
  0xa1   : > { %1691 = vmatmul.mubr.f32.vlgmr.msra.gmra.mrb[4].mxu1 %v246_v6  ;;  %1713 = vmatprep.subr.mxu0 %v1863_v0 }
  0xa2   : > { %1706 = vmatmul.mubr.f32.vlgmr.msra.gmra.mrb[8].mxu0 %v1966_v19  ;;  %1699 = vmatpush3.msra.mxu1 %v712_v38 }
  0xa3   : > { %1700 = vmatprep.mubr.msk.f32.mxu1 %vm1864_vm0, %v1863_v0  ;;  %1714 = vmatpush3.msra.mxu0 %v710_v30 }
  0xa4   : > { %1715 = vmatprep.mubr.msk.f32.mxu0 %vm1864_vm0, %v1863_v0  ;;  %1708 = vmatprep.subr.mxu1 %v1863_v0 }
  0xa5   : > { %1701 = vmatmul.mubr.f32.vlgmr.msra.gmra.mrb[6].mxu1 %v1959_v12  ;;  %1723 = vmatprep.subr.mxu0 %v1863_v0 }
  0xa6   : > { %1716 = vmatmul.mubr.f32.vlgmr.msra.gmra.mrb[10].mxu0 %v1959_v12  ;;  %1709 = vmatpush3.msra.mxu1 %v1963_v18 }
  0xa7   : > { %1724 = vmatpush3.msra.mxu0 %v1087_v34  ;;  %1710 = vmatprep.mubr.msk.f32.mxu1 %vm1864_vm0, %v1863_v0 }
  0xa8   : > { %1725 = vmatprep.mubr.msk.f32.mxu0 %vm1864_vm0, %v1863_v0  ;;  %1733 = vmatprep.subr.mxu0 %v1863_v0 }
  0xa9   : > { %1711 = vmatmul.mubr.f32.vlgmr.msra.gmra.mrb[8].mxu1 %v699_v24  ;;  %1718 = vmatprep.subr.mxu1 %v1863_v0 }
  0xaa   : > { %1726 = vmatmul.mubr.f32.vlgmr.msra.gmra.mrb[12].mxu0 %v1156_v43  ;;  %1719 = vmatpush3.msra.mxu1 %v1963_v18 }
  0xab   : > { %1734 = vmatpush3.msra.mxu0 %v1164_v37  ;;  %1720 = vmatprep.mubr.msk.f32.mxu1 %vm1864_vm0, %v1863_v0 }
  0xac   : > { %1728 = vmatprep.subr.mxu1 %v1863_v0  ;;  %1735 = vmatprep.mubr.msk.f32.mxu0 %vm1864_vm0, %v1863_v0 }
  0xad   : > { %1743 = vmatprep.subr.mxu0 %v1863_v0  ;;  %1721 = vmatmul.mubr.f32.vlgmr.msra.gmra.mrb[10].mxu1 %v1959_v12 }
  0xae   : > { %1729 = vmatpush3.msra.mxu1 %v1167_v44  ;;  %1736 = vmatmul.mubr.f32.vlgmr.msra.gmra.mrb[14].mxu0 %v1153_v36 }
  0xaf   : > { %1744 = vmatpush3.msra.mxu0 %v1165_v40  ;;  %1730 = vmatprep.mubr.msk.f32.mxu1 %vm1864_vm0, %v1863_v0 }
  0xb0   : > { %1738 = vmatprep.subr.mxu1 %v1863_v0  ;;  %1745 = vmatprep.mubr.msk.f32.mxu0 %vm1864_vm0, %v1863_v0 }
  0xb1   : > { %1731 = vmatmul.mubr.f32.vlgmr.msra.gmra.mrb[12].mxu1 %v1981_v31 }
  0xb2   : > { %1739 = vmatpush3.msra.mxu1 %v1087_v34  ;;  %1740 = vmatprep.mubr.msk.f32.mxu1 %vm1864_vm0, %v1863_v0 }
  0xb3   : > { %1748 = vmatprep.subr.mxu1 %v1863_v0  ;;  %1746 = vmatmul.mubr.f32.vlgmr.msra.gmra.mrb[16].mxu0 %v1981_v31 }
  0xb5   : > { %1741 = vmatmul.mubr.f32.vlgmr.msra.gmra.mrb[14].mxu1 %v1154_v39 }
  0xb6   : > { %1749 = vmatpush3.msra.mxu1 %v1087_v34  ;;  %1750 = vmatprep.mubr.msk.f32.mxu1 %vm1864_vm0, %v1863_v0 }
  0xb9   : > { %1751 = vmatmul.mubr.f32.vlgmr.msra.gmra.mrb[16].mxu1 %v1981_v31 }
 0x164   : > { %v252_v45 = vpop.f32.mrb[0].mxu0 }
 0x165   : > { %v1667_v46 = vpop.f32.mrb[1].mxu0 }
 0x168   : > { %v402_v47 = vpop.f32.mrb[2].mxu0 }
 0x169   : > { %v1677_v48 = vpop.f32.mrb[3].mxu0 }
 0x16c   : > { %v328_v49 = vpop.f32.mrb[0].mxu1 }
 0x16d   : > { %v329_v50 = vadd.f32 %v328_v49, %v252_v45  ;;  %v1672_v51 = vpop.f32.mrb[1].mxu1  ;;  %v550_v52 = vpop.f32.mrb[4].mxu0 }
 0x16e   : > { %v1687_v53 = vpop.f32.mrb[5].mxu0 }
 0x16f   : > { %v403_v54 = vadd.f32 %v402_v47, %v329_v50 }
 0x170   : > { %v476_v55 = vpop.f32.mrb[2].mxu1 }
 0x171   : > { %v477_v56 = vadd.f32 %v476_v55, %v403_v54  ;;  %v1682_v57 = vpop.f32.mrb[3].mxu1  ;;  %v703_v58 = vpop.f32.mrb[6].mxu0 }
 0x172   : > { %v1697_v59 = vpop.f32.mrb[7].mxu0 }
 0x173   : > { %v551_v60 = vadd.f32 %v550_v52, %v477_v56 }
 0x174   : > { %v622_v61 = vpop.f32.mrb[4].mxu1 }
 0x175   : > { %v623_v62 = vadd.f32 %v622_v61, %v551_v60  ;;  %v1692_v63 = vpop.f32.mrb[5].mxu1  ;;  %v853_v0 = vpop.f32.mrb[8].mxu0 }
 0x176   : > { %v1707_v1 = vpop.f32.mrb[9].mxu0 }
 0x177   : > { %v704_v2 = vadd.f32 %v703_v58, %v623_v62 }
 0x178   : > { %v779_v3 = vpop.f32.mrb[6].mxu1 }
 0x179   : > { %v780_v4 = vadd.f32 %v779_v3, %v704_v2  ;;  %v1702_v5 = vpop.f32.mrb[7].mxu1  ;;  %v1001_v6 = vpop.f32.mrb[10].mxu0 }
 0x17a   : > { %v1717_v7 = vpop.f32.mrb[11].mxu0 }
 0x17b   : > { %v854_v8 = vadd.f32 %v853_v0, %v780_v4 }
 0x17c   : > { %v927_v9 = vpop.f32.mrb[8].mxu1 }
 0x17d   : > { %v928_v10 = vadd.f32 %v927_v9, %v854_v8  ;;  %v1712_v11 = vpop.f32.mrb[9].mxu1  ;;  %v1158_v12 = vpop.f32.mrb[12].mxu0 }
 0x17e   : > { %v1727_v13 = vpop.f32.mrb[13].mxu0 }
 0x17f   : > { %v1002_v14 = vadd.f32 %v1001_v6, %v928_v10 }
 0x180   : > { %v1073_v15 = vpop.f32.mrb[10].mxu1 }
 0x181   : > { %v1074_v16 = vadd.f32 %v1073_v15, %v1002_v14  ;;  %v1722_v17 = vpop.f32.mrb[11].mxu1  ;;  %v1308_v18 = vpop.f32.mrb[14].mxu0 }
 0x182   : > { %v1737_v19 = vpop.f32.mrb[15].mxu0 }
 0x184   : > { %v1234_v20 = vpop.f32.mrb[12].mxu1 }
 0x185   : > { %v1235_v21 = vadd.f32 %v1234_v20, %v1158_v12  ;;  %v1732_v22 = vpop.f32.mrb[13].mxu1 }
 0x186   : > { %v1456_v23 = vpop.f32.mrb[16].mxu0 }
 0x187   : > { %v1309_v24 = vadd.f32 %v1308_v18, %v1235_v21  ;;  %v1747_v25 = vpop.f32.mrb[17].mxu0 }
 0x188   : > { %v1382_v26 = vpop.f32.mrb[14].mxu1 }
 0x189   : > { %v1383_v27 = vadd.f32 %v1382_v26, %v1309_v24  ;;  %v1742_v28 = vpop.f32.mrb[15].mxu1 }
 0x18b   : > { %v1457_v29 = vadd.f32 %v1456_v23, %v1383_v27 }
 0x18c   : > { %v1528_v30 = vpop.f32.mrb[16].mxu1 }
 0x18d   : > { %v1529_v31 = vadd.f32 %v1528_v30, %v1457_v29  ;;  %v1752_v32 = vpop.f32.mrb[17].mxu1 }
 0x18f   : > { %v1532_v34 = vadd.f32 %v1529_v31, %v1074_v16 }
 0x191   : > { %v1539_v35 = vadd.f32 %v1537_v33, %v1532_v34 }
 0x193   : > { %1541 = vst.msk [vmem:[%s161_s24] sm:$0xff] %vm1540_vm3, %v1539_v35 }
 0x194   : > { %1812 = shalt.err (!%p1809_p3)
}
 0x195   : > { %s1813_s6 = scalar_lea.hbm %s2042_s28, 128  ;;  %s1817_s9 = scalar_lea.hbm %s2087_s3, 256 }
 0x196   : > { %p1814_p4 = scmp.ne.s32.totalorder %s2042_s28, %s1813_s6  ;;  %p1818_p9 = scmp.lt.u32.totalorder %s2042_s28, %s2087_s3 }
 0x197   : > { %p1819_p10 = scmp.lt.u32.totalorder %s1817_s9, %s1813_s6  ;;  %p1821_p12 = scmp.lt.u32.totalorder %s1813_s6, %s2042_s28 }
 0x198   : > { %p1815_p7 = pnand %p1814_p4, %p1927_p5 }
 0x199   : > { %p1820_p11 = por %p1819_p10, %p1818_p9 }
 0x19a   : > { %p1816_p8 = pneg %p1815_p7 }
 0x19b   : > { %p1822_p13 = por %p1821_p12, %p1820_p11 }
 0x19d   : > { %p1823_p0 = pnand %p1822_p13, %p1816_p8 }
 0x19f   : > { %1826 = shalt.err (!%p1823_p0)
}
 0x1a0   : > { %1753 = dma.vmem_to_hbm [thread:$0]  (%p1927_p5), %s2044_s25, 128, %s2042_s28, %s1543_s29  }
 0x1a1 PF: > { %p1759_p1 = scmp.ge.s32.totalorder %s1861_s15, 2  ;;  %s1568_s17 = sand.u32 1, %s1849_s12  }
 0x1a2   : > { %s1569_s19 = scalar_lea.sflag [#allocation3], %s1568_s17 }
 0x1a3   : > { %p1756_p2 = pnand %p1759_p1, %p1931_p6 }
 0x1a5   : > { %1844 = dma.done.wait (!%p1756_p2), %s1569_s19, 128  }
 0x1a6   : > { %1846 = vsyncadd (!%p1756_p2), %s1569_s19, 4294967168  ;;  %p13_p3 = scmp.ge.s32.totalorder %s1914_s18, 4   ;;  %s2090_s12 = smov %s1853_s13 }
 0x1a7   : > { %s2091_s13 = smov %s1857_s14  ;;  %s2092_s14 = smov %s1925_s21 }
 0x1a8   : > { %s2093_s15 = smov %s1914_s18  ;;  %15 = sbr.rel (!%p13_p3) target bundleno = 3 (0x3), region = 69 }
 0x1af   :  { %1574 = vsyncpa [#allocation3], 1 }
 0x1b0   :  { %1576 = vsyncpa [#allocation3 + $0x1], 1 }

</bundles_post_ra>
